<compile_context>
chip_gen: v6e
topology: v6e:2x2x1
jax: 0.10.0
libtpu: 0.0.40
codegen_flags: <defaults>
</compile_context>

<pallas_src>
import functools
import numpy as np
import jax
import jax.numpy as jnp
from jax.experimental import pallas as pl
from jax.experimental.pallas import tpu as pltpu

POOL_SIZES = (1, 2, 3, 6)
KPAD = 128              # per-branch pooled block padded k*k -> 128 lanes (aligned slices)
KTOT = 4 * KPAD         # 512: fused pooled width for the single wide pooling matmul


# ------------------------- matrix builders (host-side glue) -----------------

def _adaptive_pool_matrix(k, n):
    """(k, n) matrix M s.t. M @ v == AdaptiveAvgPool1d(k)(v) (PyTorch semantics)."""
    P = np.zeros((k, n), dtype=np.float32)
    for i in range(k):
        s = (i * n) // k
        e = -((-(i + 1) * n) // k)          # ceil((i+1)*n/k)
        P[i, s:e] = 1.0 / (e - s)
    return P


def _bilinear_up_matrix(n, k):
    """(n, k) matrix U s.t. U @ v == F.interpolate(v, n, 'linear', align_corners=True)."""
    U = np.zeros((n, k), dtype=np.float32)
    if k == 1:
        U[:, 0] = 1.0
        return U
    for i in range(n):
        pos = i * (k - 1) / (n - 1)
        lo = min(int(np.floor(pos)), k - 2)
        frac = pos - lo
        U[i, lo] += 1.0 - frac
        U[i, lo + 1] += frac
    return U


def _fused_matrices(H, W, HWp):
    """Mp_all (HWp, 512): all four pooling maps packed side by side (branch br in
    lanes [br*128, br*128 + k*k), rest zero, padded HW rows zero).
    Mu_all (4, 128, HWp): per-branch upsample maps (rows >= k*k and columns >= HW zero)."""
    HW = H * W
    Mp = np.zeros((HWp, KTOT), dtype=np.float32)
    Mu = np.zeros((4, KPAD, HWp), dtype=np.float32)
    for br, k in enumerate(POOL_SIZES):
        Ph = _adaptive_pool_matrix(k, H)          # (k, H)
        Pw = _adaptive_pool_matrix(k, W)          # (k, W)
        Uh = _bilinear_up_matrix(H, k)            # (H, k)
        Uw = _bilinear_up_matrix(W, k)            # (W, k)
        # pooled[p,q] = sum_{h,w} Ph[p,h] Pw[q,w] x[h,w]
        Mp[:HW, br * KPAD: br * KPAD + k * k] = np.einsum(
            "ph,qw->hwpq", Ph, Pw).reshape(HW, k * k)
        # out[h,w]    = sum_{p,q} Uh[h,p] Uw[w,q] y[p,q]
        Mu[br, :k * k, :HW] = np.einsum(
            "hp,wq->pqhw", Uh, Uw).reshape(k * k, HW)
    return jnp.asarray(Mp), jnp.asarray(Mu)


# ------------------------------ Pallas kernel --------------------------------

def _psp_kernel(x_ref, mp_ref, mu_ref, w_ref, b_ref, o_ref, *, C, Cout):
    x = x_ref[...]                                            # (C, HWp) f32

    # (1) all four adaptive average pools in ONE wide MXU matmul (f32 acc).
    pooled = jnp.dot(x, mp_ref[...],
                     preferred_element_type=jnp.float32)      # (C, KTOT)

    # (2)+(3) per branch (statically unrolled): folded 1x1conv+BN, ReLU, then
    # bilinear upsample.  Lane slices are 128-aligned; output stores are
    # lane-dense (masked sublanes only when Cout % 8 != 0, i.e. toy shapes).
    for br in range(4):
        p_br = pooled[:, br * KPAD:(br + 1) * KPAD]           # (C, KPAD)
        z_br = jnp.dot(w_ref[br], p_br,
                       preferred_element_type=jnp.float32)    # (Cout, KPAD)
        y_br = jnp.maximum(z_br + b_ref[br], 0.0)             # bias + ReLU
        feat_br = jnp.dot(y_br, mu_ref[br],
                          preferred_element_type=jnp.float32) # (Cout, HWp)
        o_ref[C + br * Cout: C + (br + 1) * Cout, :] = feat_br

    # Exact f32 pass-through of the input into the first C output rows.
    # TODO(synk): on v5e this copy could be a VMEM->VMEM async DMA to free the
    # single vst slot if profiling shows the store epilogue exposed.
    o_ref[:C, :] = x


# ------------------------------- wrapper --------------------------------------

def _vmem_limit_bytes():
    """Scoped-VMEM limit with headroom, gated on the chip actually present
    (~48 MiB on v7x's 64 MiB, ~96 MiB on v5e/v6e's 128 MiB)."""
    try:
        cap = int(pltpu.get_tpu_info().vmem_capacity_bytes)
    except Exception:
        return None
    return (cap * 3) // 4


def pyramid_pooling(x, conv_w, bn_gamma, bn_beta, bn_mean, bn_var, eps=1e-5):
    """x: (N, C, H, W) f32.  conv_w: (4, C//4, C).  Returns (N, 2C, H, W) f32."""
    N, C, H, W = x.shape
    assert C % 4 == 0, "PSP needs C divisible by 4"
    assert C % 8 == 0, "row-blocked 2-D layout assumes sublane-aligned C (see TODO)"
    Cout = C // 4
    HW = H * W
    HWp = max(128, ((HW + 127) // 128) * 128)   # lane-dense last dim

    # Fold 1x1 conv (no bias) + BatchNorm (eval semantics) into per-branch affine.
    scale = bn_gamma / jnp.sqrt(bn_var + eps)                     # (4, Cout)
    w_eff = (conv_w * scale[:, :, None]).astype(jnp.float32)      # (4, Cout, C)
    b_eff = (bn_beta - bn_mean * scale).reshape(4, Cout, 1)       # (4, Cout, 1)

    # Fused pooling / upsampling matrices (f32: no bf16 rounding of weights).
    Mp_all, Mu_all = _fused_matrices(H, W, HWp)

    # 2-D row-blocked layout: x as (N*C, HWp), output as (N*2C, HWp).
    xf = x.reshape(N * C, HW)
    if HWp != HW:
        xf = jnp.pad(xf, ((0, 0), (0, HWp - HW)))

    kernel = functools.partial(_psp_kernel, C=C, Cout=Cout)

    cp_kwargs = dict(dimension_semantics=("parallel",))
    vmem_limit = _vmem_limit_bytes()
    if vmem_limit is not None:
        cp_kwargs["vmem_limit_bytes"] = vmem_limit

    # Grid-invariant operands: single pipeline buffer (fetched once, no waste).
    const = dict(pipeline_mode=pl.Buffered(1))

    out_flat = pl.pallas_call(
        kernel,
        out_shape=jax.ShapeDtypeStruct((N * 2 * C, HWp), jnp.float32),
        grid=(N,),                                  # >= 2 steps: pipelining + megacore
        in_specs=[
            pl.BlockSpec((C, HWp), lambda i: (i, 0)),                      # x rows of sample i
            pl.BlockSpec((HWp, KTOT), lambda i: (0, 0), **const),          # Mp_all  (f32)
            pl.BlockSpec((4, KPAD, HWp), lambda i: (0, 0, 0), **const),    # Mu_all  (f32)
            pl.BlockSpec((4, Cout, C), lambda i: (0, 0, 0), **const),      # folded conv+BN weight
            pl.BlockSpec((4, Cout, 1), lambda i: (0, 0, 0), **const),      # folded bias column
        ],
        out_specs=pl.BlockSpec((2 * C, HWp), lambda i: (i, 0)),
        compiler_params=pltpu.CompilerParams(**cp_kwargs),
    )(xf, Mp_all, Mu_all, w_eff, b_eff)

    if HWp != HW:
        out_flat = out_flat[:, :HW]
    return out_flat.reshape(N, 2 * C, H, W)


# --------------------------- pure-JAX f32 reference ---------------------------

def _reference(x, conv_w, bn_gamma, bn_beta, bn_mean, bn_var, eps=1e-5):
    N, C, H, W = x.shape
    scale = bn_gamma / jnp.sqrt(bn_var + eps)
    w_eff = conv_w * scale[:, :, None]
    b_eff = bn_beta - bn_mean * scale
    feats = [x]
    for br, k in enumerate(POOL_SIZES):
        Ph = jnp.asarray(_adaptive_pool_matrix(k, H))
        Pw = jnp.asarray(_adaptive_pool_matrix(k, W))
        Uh = jnp.asarray(_bilinear_up_matrix(H, k))
        Uw = jnp.asarray(_bilinear_up_matrix(W, k))
        pooled = jnp.einsum("ph,qw,nchw->ncpq", Ph, Pw, x)
        y = jnp.maximum(jnp.einsum("oc,ncpq->nopq", w_eff[br], pooled)
                        + b_eff[br][None, :, None, None], 0.0)
        feat = jnp.einsum("hp,wq,nopq->nohw", Uh, Uw, y)
        feats.append(feat)
    return jnp.concatenate(feats, axis=1)


# ----------------------------------- main --------------------------------------

if __name__ == "__main__":
    key = jax.random.PRNGKey(0)
    N, C, H, W = 2, 16, 16, 16
    Cout = C // 4

    k_x, k_w, k_g, k_b = jax.random.split(key, 4)
    x = jax.random.normal(k_x, (N, C, H, W), dtype=jnp.float32)

    # Deterministic synthetic parameters (Conv2d 1x1 weights + BatchNorm2d, eval).
    conv_w = 0.1 * jax.random.normal(k_w, (4, Cout, C), dtype=jnp.float32)
    bn_gamma = 1.0 + 0.1 * jax.random.normal(k_g, (4, Cout), dtype=jnp.float32)
    bn_beta = 0.1 * jax.random.normal(k_b, (4, Cout), dtype=jnp.float32)
    bn_mean = jnp.zeros((4, Cout), dtype=jnp.float32)
    bn_var = jnp.ones((4, Cout), dtype=jnp.float32)

    out = pyramid_pooling(x, conv_w, bn_gamma, bn_beta, bn_mean, bn_var)
    out = jax.block_until_ready(out)

    ref = _reference(x, conv_w, bn_gamma, bn_beta, bn_mean, bn_var)
    assert out.shape == (N, 2 * C, H, W), out.shape
    # Pass-through channels go through the kernel untouched in f32.
    assert jnp.allclose(out[:, :C], x), "pass-through mismatch"
    # Branch features: f32 operands with f32 accumulation.
    assert jnp.allclose(out, ref, atol=1e-2, rtol=1e-2), "mismatch vs reference"

    print("KERNEL_OK")
</pallas_src>

<mosaic_0001>
module attributes {stable_mosaic.version = 11 : i64} {
  func.func @_psp_kernel(%arg0: i32, %arg1: memref<16x256xf32, #tpu.memory_space<vmem>>, %arg2: memref<256x512xf32, #tpu.memory_space<vmem>>, %arg3: memref<4x128x256xf32, #tpu.memory_space<vmem>>, %arg4: memref<4x4x16xf32, #tpu.memory_space<vmem>>, %arg5: memref<4x4x1xf32, #tpu.memory_space<vmem>>, %arg6: memref<32x256xf32, #tpu.memory_space<vmem>>) attributes {dimension_semantics = [#tpu.dimension_semantics<parallel>], iteration_bounds = array<i64: 2>, scalar_prefetch = 0 : i64, scratch_operands = 0 : i64, tpu.core_type = #tpu.core_type<tc>, window_params = [{transform_indices = @transform_0, window_bounds = array<i64: 16, 256>}, {pipeline_mode = #tpu.pipeline_mode<synchronous>, transform_indices = @transform_1, window_bounds = array<i64: 256, 512>}, {pipeline_mode = #tpu.pipeline_mode<synchronous>, transform_indices = @transform_2, window_bounds = array<i64: 4, 128, 256>}, {pipeline_mode = #tpu.pipeline_mode<synchronous>, transform_indices = @transform_3, window_bounds = array<i64: 4, 4, 16>}, {pipeline_mode = #tpu.pipeline_mode<synchronous>, transform_indices = @transform_4, window_bounds = array<i64: 4, 4, 1>}, {transform_indices = @transform_5, window_bounds = array<i64: 32, 256>}]} {
    %c0 = arith.constant 0 : index
    %c0_0 = arith.constant 0 : index
    %0 = vector.load %arg1[%c0, %c0_0] : memref<16x256xf32, #tpu.memory_space<vmem>>, vector<16x256xf32>
    %c0_1 = arith.constant 0 : index
    %c0_2 = arith.constant 0 : index
    %1 = vector.load %arg2[%c0_1, %c0_2] : memref<256x512xf32, #tpu.memory_space<vmem>>, vector<256x512xf32>
    %cst = arith.constant dense<0.000000e+00> : vector<16x512xf32>
    %2 = tpu.matmul %0, %1, %cst {dimension_numbers = #tpu.dot_dimension_numbers<[1], [0], [0], [1], [0, 0, 1, 1], [], []>} : vector<16x256xf32>, vector<256x512xf32>, vector<16x512xf32> -> vector<16x512xf32>
    %3 = vector.extract_strided_slice %2 {offsets = [0, 0], sizes = [16, 128], strides = [1, 1]} : vector<16x512xf32> to vector<16x128xf32>
    %c0_3 = arith.constant 0 : index
    %c0_4 = arith.constant 0 : index
    %c0_5 = arith.constant 0 : index
    %4 = vector.load %arg4[%c0_3, %c0_4, %c0_5] : memref<4x4x16xf32, #tpu.memory_space<vmem>>, vector<1x4x16xf32>
    %5 = vector.shape_cast %4 : vector<1x4x16xf32> to vector<4x16xf32>
    %cst_6 = arith.constant dense<0.000000e+00> : vector<4x128xf32>
    %6 = tpu.matmul %5, %3, %cst_6 {dimension_numbers = #tpu.dot_dimension_numbers<[1], [0], [0], [1], [0, 0, 1, 1], [], []>} : vector<4x16xf32>, vector<16x128xf32>, vector<4x128xf32> -> vector<4x128xf32>
    %c0_7 = arith.constant 0 : index
    %c0_8 = arith.constant 0 : index
    %c0_9 = arith.constant 0 : index
    %7 = vector.load %arg5[%c0_7, %c0_8, %c0_9] : memref<4x4x1xf32, #tpu.memory_space<vmem>>, vector<1x4x1xf32>
    %8 = vector.shape_cast %7 : vector<1x4x1xf32> to vector<4x1xf32>
    %9 = vector.broadcast %8 : vector<4x1xf32> to vector<4x128xf32>
    %10 = arith.addf %6, %9 : vector<4x128xf32>
    %cst_10 = arith.constant 0.000000e+00 : f32
    %11 = vector.broadcast %cst_10 : f32 to vector<4x128xf32>
    %12 = arith.maximumf %10, %11 : vector<4x128xf32>
    %c0_11 = arith.constant 0 : index
    %c0_12 = arith.constant 0 : index
    %c0_13 = arith.constant 0 : index
    %13 = vector.load %arg3[%c0_11, %c0_12, %c0_13] : memref<4x128x256xf32, #tpu.memory_space<vmem>>, vector<1x128x256xf32>
    %14 = vector.shape_cast %13 : vector<1x128x256xf32> to vector<128x256xf32>
    %cst_14 = arith.constant dense<0.000000e+00> : vector<4x256xf32>
    %15 = tpu.matmul %12, %14, %cst_14 {dimension_numbers = #tpu.dot_dimension_numbers<[1], [0], [0], [1], [0, 0, 1, 1], [], []>} : vector<4x128xf32>, vector<128x256xf32>, vector<4x256xf32> -> vector<4x256xf32>
    %c16 = arith.constant 16 : index
    %c0_15 = arith.constant 0 : index
    %16 = vector.load %arg6[%c16, %c0_15] : memref<32x256xf32, #tpu.memory_space<vmem>>, vector<4x256xf32>
    tpu.vector_store %arg6[%c16, %c0_15], %15 {strides = array<i32>} : memref<32x256xf32, #tpu.memory_space<vmem>>, vector<4x256xf32>,
    %17 = vector.extract_strided_slice %2 {offsets = [0, 128], sizes = [16, 128], strides = [1, 1]} : vector<16x512xf32> to vector<16x128xf32>
    %c1 = arith.constant 1 : index
    %c0_16 = arith.constant 0 : index
    %c0_17 = arith.constant 0 : index
    %18 = vector.load %arg4[%c1, %c0_16, %c0_17] : memref<4x4x16xf32, #tpu.memory_space<vmem>>, vector<1x4x16xf32>
    %19 = vector.shape_cast %18 : vector<1x4x16xf32> to vector<4x16xf32>
    %cst_18 = arith.constant dense<0.000000e+00> : vector<4x128xf32>
    %20 = tpu.matmul %19, %17, %cst_18 {dimension_numbers = #tpu.dot_dimension_numbers<[1], [0], [0], [1], [0, 0, 1, 1], [], []>} : vector<4x16xf32>, vector<16x128xf32>, vector<4x128xf32> -> vector<4x128xf32>
    %c1_19 = arith.constant 1 : index
    %c0_20 = arith.constant 0 : index
    %c0_21 = arith.constant 0 : index
    %21 = vector.load %arg5[%c1_19, %c0_20, %c0_21] : memref<4x4x1xf32, #tpu.memory_space<vmem>>, vector<1x4x1xf32>
    %22 = vector.shape_cast %21 : vector<1x4x1xf32> to vector<4x1xf32>
    %23 = vector.broadcast %22 : vector<4x1xf32> to vector<4x128xf32>
    %24 = arith.addf %20, %23 : vector<4x128xf32>
    %cst_22 = arith.constant 0.000000e+00 : f32
    %25 = vector.broadcast %cst_22 : f32 to vector<4x128xf32>
    %26 = arith.maximumf %24, %25 : vector<4x128xf32>
    %c1_23 = arith.constant 1 : index
    %c0_24 = arith.constant 0 : index
    %c0_25 = arith.constant 0 : index
    %27 = vector.load %arg3[%c1_23, %c0_24, %c0_25] : memref<4x128x256xf32, #tpu.memory_space<vmem>>, vector<1x128x256xf32>
    %28 = vector.shape_cast %27 : vector<1x128x256xf32> to vector<128x256xf32>
    %cst_26 = arith.constant dense<0.000000e+00> : vector<4x256xf32>
    %29 = tpu.matmul %26, %28, %cst_26 {dimension_numbers = #tpu.dot_dimension_numbers<[1], [0], [0], [1], [0, 0, 1, 1], [], []>} : vector<4x128xf32>, vector<128x256xf32>, vector<4x256xf32> -> vector<4x256xf32>
    %c20 = arith.constant 20 : index
    %c0_27 = arith.constant 0 : index
    %30 = vector.load %arg6[%c20, %c0_27] : memref<32x256xf32, #tpu.memory_space<vmem>>, vector<4x256xf32>
    tpu.vector_store %arg6[%c20, %c0_27], %29 {strides = array<i32>} : memref<32x256xf32, #tpu.memory_space<vmem>>, vector<4x256xf32>,
    %31 = vector.extract_strided_slice %2 {offsets = [0, 256], sizes = [16, 128], strides = [1, 1]} : vector<16x512xf32> to vector<16x128xf32>
    %c2 = arith.constant 2 : index
    %c0_28 = arith.constant 0 : index
    %c0_29 = arith.constant 0 : index
    %32 = vector.load %arg4[%c2, %c0_28, %c0_29] : memref<4x4x16xf32, #tpu.memory_space<vmem>>, vector<1x4x16xf32>
    %33 = vector.shape_cast %32 : vector<1x4x16xf32> to vector<4x16xf32>
    %cst_30 = arith.constant dense<0.000000e+00> : vector<4x128xf32>
    %34 = tpu.matmul %33, %31, %cst_30 {dimension_numbers = #tpu.dot_dimension_numbers<[1], [0], [0], [1], [0, 0, 1, 1], [], []>} : vector<4x16xf32>, vector<16x128xf32>, vector<4x128xf32> -> vector<4x128xf32>
    %c2_31 = arith.constant 2 : index
    %c0_32 = arith.constant 0 : index
    %c0_33 = arith.constant 0 : index
    %35 = vector.load %arg5[%c2_31, %c0_32, %c0_33] : memref<4x4x1xf32, #tpu.memory_space<vmem>>, vector<1x4x1xf32>
    %36 = vector.shape_cast %35 : vector<1x4x1xf32> to vector<4x1xf32>
    %37 = vector.broadcast %36 : vector<4x1xf32> to vector<4x128xf32>
    %38 = arith.addf %34, %37 : vector<4x128xf32>
    %cst_34 = arith.constant 0.000000e+00 : f32
    %39 = vector.broadcast %cst_34 : f32 to vector<4x128xf32>
    %40 = arith.maximumf %38, %39 : vector<4x128xf32>
    %c2_35 = arith.constant 2 : index
    %c0_36 = arith.constant 0 : index
    %c0_37 = arith.constant 0 : index
    %41 = vector.load %arg3[%c2_35, %c0_36, %c0_37] : memref<4x128x256xf32, #tpu.memory_space<vmem>>, vector<1x128x256xf32>
    %42 = vector.shape_cast %41 : vector<1x128x256xf32> to vector<128x256xf32>
    %cst_38 = arith.constant dense<0.000000e+00> : vector<4x256xf32>
    %43 = tpu.matmul %40, %42, %cst_38 {dimension_numbers = #tpu.dot_dimension_numbers<[1], [0], [0], [1], [0, 0, 1, 1], [], []>} : vector<4x128xf32>, vector<128x256xf32>, vector<4x256xf32> -> vector<4x256xf32>
    %c24 = arith.constant 24 : index
    %c0_39 = arith.constant 0 : index
    %44 = vector.load %arg6[%c24, %c0_39] : memref<32x256xf32, #tpu.memory_space<vmem>>, vector<4x256xf32>
    tpu.vector_store %arg6[%c24, %c0_39], %43 {strides = array<i32>} : memref<32x256xf32, #tpu.memory_space<vmem>>, vector<4x256xf32>,
    %45 = vector.extract_strided_slice %2 {offsets = [0, 384], sizes = [16, 128], strides = [1, 1]} : vector<16x512xf32> to vector<16x128xf32>
    %c3 = arith.constant 3 : index
    %c0_40 = arith.constant 0 : index
    %c0_41 = arith.constant 0 : index
    %46 = vector.load %arg4[%c3, %c0_40, %c0_41] : memref<4x4x16xf32, #tpu.memory_space<vmem>>, vector<1x4x16xf32>
    %47 = vector.shape_cast %46 : vector<1x4x16xf32> to vector<4x16xf32>
    %cst_42 = arith.constant dense<0.000000e+00> : vector<4x128xf32>
    %48 = tpu.matmul %47, %45, %cst_42 {dimension_numbers = #tpu.dot_dimension_numbers<[1], [0], [0], [1], [0, 0, 1, 1], [], []>} : vector<4x16xf32>, vector<16x128xf32>, vector<4x128xf32> -> vector<4x128xf32>
    %c3_43 = arith.constant 3 : index
    %c0_44 = arith.constant 0 : index
    %c0_45 = arith.constant 0 : index
    %49 = vector.load %arg5[%c3_43, %c0_44, %c0_45] : memref<4x4x1xf32, #tpu.memory_space<vmem>>, vector<1x4x1xf32>
    %50 = vector.shape_cast %49 : vector<1x4x1xf32> to vector<4x1xf32>
    %51 = vector.broadcast %50 : vector<4x1xf32> to vector<4x128xf32>
    %52 = arith.addf %48, %51 : vector<4x128xf32>
    %cst_46 = arith.constant 0.000000e+00 : f32
    %53 = vector.broadcast %cst_46 : f32 to vector<4x128xf32>
    %54 = arith.maximumf %52, %53 : vector<4x128xf32>
    %c3_47 = arith.constant 3 : index
    %c0_48 = arith.constant 0 : index
    %c0_49 = arith.constant 0 : index
    %55 = vector.load %arg3[%c3_47, %c0_48, %c0_49] : memref<4x128x256xf32, #tpu.memory_space<vmem>>, vector<1x128x256xf32>
    %56 = vector.shape_cast %55 : vector<1x128x256xf32> to vector<128x256xf32>
    %cst_50 = arith.constant dense<0.000000e+00> : vector<4x256xf32>
    %57 = tpu.matmul %54, %56, %cst_50 {dimension_numbers = #tpu.dot_dimension_numbers<[1], [0], [0], [1], [0, 0, 1, 1], [], []>} : vector<4x128xf32>, vector<128x256xf32>, vector<4x256xf32> -> vector<4x256xf32>
    %c28 = arith.constant 28 : index
    %c0_51 = arith.constant 0 : index
    %58 = vector.load %arg6[%c28, %c0_51] : memref<32x256xf32, #tpu.memory_space<vmem>>, vector<4x256xf32>
    tpu.vector_store %arg6[%c28, %c0_51], %57 {strides = array<i32>} : memref<32x256xf32, #tpu.memory_space<vmem>>, vector<4x256xf32>,
    %c0_52 = arith.constant 0 : index
    %c0_53 = arith.constant 0 : index
    %59 = vector.load %arg6[%c0_52, %c0_53] : memref<32x256xf32, #tpu.memory_space<vmem>>, vector<16x256xf32>
    tpu.vector_store %arg6[%c0_52, %c0_53], %0 {strides = array<i32>} : memref<32x256xf32, #tpu.memory_space<vmem>>, vector<16x256xf32>,
    return
  }
  func.func @transform_0(%arg0: i32) -> (i32, i32) {
    %c0_i32 = arith.constant 0 : i32
    %c0_i32_0 = arith.constant 0 : i32
    return %arg0, %c0_i32 : i32, i32
  }
  func.func @transform_1(%arg0: i32) -> (i32, i32) {
    %c0_i32 = arith.constant 0 : i32
    %c0_i32_0 = arith.constant 0 : i32
    %c0_i32_1 = arith.constant 0 : i32
    return %c0_i32, %c0_i32_0 : i32, i32
  }
  func.func @transform_2(%arg0: i32) -> (i32, i32, i32) {
    %c0_i32 = arith.constant 0 : i32
    %c0_i32_0 = arith.constant 0 : i32
    %c0_i32_1 = arith.constant 0 : i32
    %c0_i32_2 = arith.constant 0 : i32
    return %c0_i32, %c0_i32_0, %c0_i32_1 : i32, i32, i32
  }
  func.func @transform_3(%arg0: i32) -> (i32, i32, i32) {
    %c0_i32 = arith.constant 0 : i32
    %c0_i32_0 = arith.constant 0 : i32
    %c0_i32_1 = arith.constant 0 : i32
    %c0_i32_2 = arith.constant 0 : i32
    return %c0_i32, %c0_i32_0, %c0_i32_1 : i32, i32, i32
  }
  func.func @transform_4(%arg0: i32) -> (i32, i32, i32) {
    %c0_i32 = arith.constant 0 : i32
    %c0_i32_0 = arith.constant 0 : i32
    %c0_i32_1 = arith.constant 0 : i32
    %c0_i32_2 = arith.constant 0 : i32
    return %c0_i32, %c0_i32_0, %c0_i32_1 : i32, i32, i32
  }
  func.func @transform_5(%arg0: i32) -> (i32, i32) {
    %c0_i32 = arith.constant 0 : i32
    %c0_i32_0 = arith.constant 0 : i32
    return %arg0, %c0_i32 : i32, i32
  }
}

</mosaic_0001>

<bundles_post_ra>
// kernel: tpu_custom_call.1
= control target key start
LH: loop header
LB: loop body
LE: loop exit
PB: predicated region body
PF: predicated region fallthrough
CT: control target
= control target key end

     0   :  { %10 = vsyncpa [#allocation3], 0  ;;  %s2067_s0 = inlined_call_operand.hbm [shape: f32[32,256], index: 0, kind: input, shape index: {}]   ;;  %s2068_s1 = inlined_call_operand.hbm [shape: f32[256,512], index: 1, kind: input, shape index: {}]   ;;  %s2069_s2 = inlined_call_operand.hbm [shape: f32[4,128,256], index: 2, kind: input, shape index: {}]   ;;  %s2070_s3 = inlined_call_operand.vmem [shape: f32[4,4,16], index: 3, kind: input, shape index: {}]   ;;  %s2071_s4 = inlined_call_operand.vmem [shape: f32[4,4,1], index: 4, kind: input, shape index: {}]   ;;  %s2072_s5 = inlined_call_operand.hbm [shape: f32[64,256], index: 5, kind: output, shape index: {}]  }
   0x1   :  { %12 = vsyncpa [#allocation3 + $0x1], 0 }
   0x2   :  { %13 = vsyncpa [#allocation6], 0 }
   0x3   :  { %14 = vsyncpa [#allocation4], 0 }
   0x4   :  { %16 = vsyncpa [#allocation4 + $0x1], 0  ;;  %s1783_s18 = smov 0   ;;  %s1785_s19 = smov 0  }
   0x5   :  { %s1787_s20 = smov 0   ;;  %s1789_s21 = smov 0  }
   0x6 LB: > { %s1804_s22 = sadd.s32 4294967295, %s1738_s21   ;;  %s1438_s23 = sadd.s32 4294967294, %s1738_s21   ;;  %s1738_s21 = sphi %s1789_s21, %s2096_s21   ;;  %s1734_s20 = sphi %s1787_s20, %s2095_s20   ;;  %s1730_s19 = sphi %s1785_s19, %s2094_s19   ;;  %s1726_s18 = sphi %s1783_s18, %s2093_s18  }
   0x7   : > { %p42_p0 = scmp.ne.s32.totalorder %s1730_s19, %s1726_s18  ;;  %p2073_p1 = scmp.eq.s32.totalorder %s1804_s22, 0 }
   0x8   : > { %p156_p3 = scmp.eq.s32.totalorder %s1438_s23, 1  ;;  %p1439_p5 = scmp.ge.s32.totalorder %s1738_s21, 1 }
   0x9   : > { %p1813_p4 = por %p2073_p1, %p42_p0  ;;  %p163_p7 = scmp.lt.s32.totalorder %s1738_s21, 3 }
   0xa   : > { %p1818_p6 = por %p156_p3, %p42_p0  ;;  %s1740_s27 = smov [#allocation5]  }
   0xb   : > { %s2078_s24 = scalar_select %p1813_p4, 1, 0 }
   0xc   : > { %s2079_s25 = scalar_select %p1818_p6, 1, 0 }
   0xd   : > { %p1823_p8 = pnand %p1439_p5, %p163_p7  ;;  %s175_s28 = sshll.u32 %s1740_s27, 4  ;;  %s176_s28 = int_to_ptr.vmem [resolvable:$true] %s175_s28 }
   0xe   : > { %s1741_s30 = smov [#allocation7]   ;;  %s1601_s7 = scalar_lea.vmem %s176_s28, 16384 }
   0xf   : > { %s2080_s26 = scalar_select %p1823_p8, 1, 0 }
  0x10   : > { %p1524_p9 = pneg %p1823_p8  ;;  %s188_s6 = sshll.u32 %s1741_s30, 4  ;;  %s189_s6 = int_to_ptr.vmem [resolvable:$true] %s188_s6 }
  0x11   : > { %p1602_p13 = scmp.ne.s32.totalorder %s176_s28, %s1601_s7  ;;  %p1609_p5 = scmp.lt.s32.totalorder %s176_s28, %s176_s28 }
  0x12   : > { %p1832_p11 = pnand %p1524_p9, %p2073_p1  ;;  %p1610_p7 = scmp.lt.s32.totalorder %s1601_s7, %s1601_s7 }
  0x14   : > { %p1592_p12 = pneg %p1832_p11  ;;  %p1611_p10 = por %p1610_p7, %p1609_p5 }
  0x16   : > { %p1604_p0 = pnand %p1602_p13, %p1592_p12 }
  0x18   : > { %p1605_p3 = pneg %p1604_p0 }
  0x1a   : > { %p1612_p9 = pnand %p1611_p10, %p1605_p3 }
  0x1c   : > { %1615 = shalt.err (!%p1612_p9)
}
  0x1d   : > { %s1742_s8 = smov 512   ;;  %s1743_s9 = smov 32  }
  0x1e   : > { %1527 = dma.hbm_to_vmem [thread:$0]  (!%p1832_p11), %s2068_s1, 16384, %s176_s28, [#allocation6], %s1742_s8, %s1742_s8, %s1743_s9  }
  0x1f   : > { %s1627_s12 = scalar_lea.vmem %s189_s6, 16384  ;;  %p1635_p2 = scmp.lt.s32.totalorder %s189_s6, %s189_s6 }
  0x20   : > { %p1628_p1 = scmp.ne.s32.totalorder %s189_s6, %s1627_s12  ;;  %p1636_p6 = scmp.lt.s32.totalorder %s1627_s12, %s1627_s12 }
  0x22   : > { %p1630_p13 = pnand %p1628_p1, %p1592_p12  ;;  %p1637_p5 = por %p1636_p6, %p1635_p2 }
  0x24   : > { %p1631_p0 = pneg %p1630_p13 }
  0x26   : > { %p1638_p10 = pnand %p1637_p5, %p1631_p0 }
  0x28   : > { %1641 = shalt.err (!%p1638_p10)
}
  0x29   : > { %s2074_s13 = smov 256   ;;  %s1745_s14 = smov 16  }
  0x2a   : > { %1530 = dma.hbm_to_vmem [thread:$0]  (!%p1832_p11), %s2069_s2, 16384, %s189_s6, [#allocation6], %s2074_s13, %s2074_s13, %s1745_s14  }
  0x2b   : > { %s1858_s17 = sadd.s32 1, %s1738_s21   ;;  %s29_s27 = sadd.s32 1, %s1734_s20 }
  0x2c   : > { %s26_s23 = ssub.s32 %s1738_s21, %s1858_s17  ;;  %p36_p2 = scmp.ne.s32.totalorder %s1734_s20, %s1730_s19 }
  0x2d   : > { %p27_p1 = scmp.eq.s32.totalorder %s26_s23, 0  ;;  %p37_p6 = scmp.eq.s32.totalorder %s1738_s21, 0 }
  0x2e   : > { %p2082_p3 = scmp.eq.s32.totalorder %s1804_s22, 1  ;;  %p1541_p9 = scmp.lt.s32.totalorder %s1738_s21, 2 }
  0x2f   : > { %s1867_s28 = scalar_select %p27_p1, %s1734_s20, %s29_s27  }
  0x30   : > { %p38_p12 = por %p37_p6, %p36_p2  ;;  %p1871_p7 = por %p2082_p3, %p36_p2 }
  0x31   : > { %s208_s30 = sand.u32 1, %s1734_s20   ;;  %s1469_s6 = sshll.u32 %s1738_s21, 9 }
  0x32   : > { %s2083_s29 = scalar_select %p1871_p7, 1, 0 }
  0x33   : > { %s1443_s7 = sshll.u32 %s208_s30, 5  ;;  %s1881_s10 = scalar_lea.hbm %s2067_s0, %s1469_s6 }
  0x34   : > { %s212_s11 = scalar_lea.vmem [#allocation2], %s1443_s7  ;;  %p1885_p11 = pnand %p1541_p9, %p38_p12 }
  0x35   : > { %s220_s12 = sshll.u32 %s212_s11, 4  ;;  %s1889_s16 = scalar_lea.sflag [#allocation3], %s208_s30  ;;  %s1883_s12 = int_to_ptr.vmem [resolvable:$true] %s220_s12 }
  0x36   : > { %s1642_s23 = scalar_lea.hbm %s1881_s10, 512  ;;  %p1644_p0 = pneg %p1885_p11 }
  0x37   : > { %p1643_p13 = scmp.ne.s32.totalorder %s1881_s10, %s1642_s23  ;;  %s1647_s7 = scalar_lea.hbm %s2067_s0, 1024 }
  0x38   : > { %p1648_p1 = scmp.lt.s32.totalorder %s1881_s10, %s2067_s0  ;;  %p1649_p2 = scmp.lt.s32.totalorder %s1647_s7, %s1642_s23 }
  0x39   : > { %p1645_p5 = pnand %p1644_p0, %p1643_p13 }
  0x3a   : > { %p1650_p6 = por %p1649_p2, %p1648_p1 }
  0x3b   : > { %p1646_p10 = pneg %p1645_p5 }
  0x3d   : > { %p1651_p12 = pnand %p1650_p6, %p1646_p10 }
  0x3f   : > { %1654 = shalt.err (!%p1651_p12)
}
  0x40   : > { %s1655_s30 = scalar_lea.vmem %s1883_s12, 512  ;;  %s1746_s11 = smov [#allocation2]  }
  0x41   : > { %p1656_p3 = scmp.ne.s32.totalorder %s1883_s12, %s1655_s30  ;;  %s1660_s13 = sshll.u32 %s1746_s11, 4  ;;  %s1661_s13 = int_to_ptr.vmem [resolvable:$false] %s1660_s13 }
  0x42   : > { %s1662_s27 = scalar_lea.vmem %s1661_s13, 1024  ;;  %p1663_p5 = scmp.lt.s32.totalorder %s1883_s12, %s1661_s13 }
  0x43   : > { %p1658_p9 = pnand %p1656_p3, %p1644_p0  ;;  %p1664_p7 = scmp.lt.s32.totalorder %s1662_s27, %s1655_s30 }
  0x45   : > { %p1659_p13 = pneg %p1658_p9  ;;  %p1665_p4 = por %p1664_p7, %p1663_p5 }
  0x47   : > { %p1666_p8 = pnand %p1665_p4, %p1659_p13 }
  0x49   : > { %1669 = shalt.err (!%p1666_p8)
}
  0x4a   : > { %s2085_s23 = smov 256   ;;  %p2086_p0 = scmp.ne.s32.totalorder %s2080_s26, 0 }
  0x4b   : > { %1534 = dma.hbm_to_vmem [thread:$0]  (!%p1885_p11), %s1881_s10, 512, %s1883_s12, %s1889_s16, %s2085_s23, %s2085_s23, %s1745_s14  }
  0x4c   : > { %232 = sbr.rel (%p2086_p0) target bundleno = 961 (0x3c1), region = 40  ;;  %s1916_s6 = sand.u32 (!%p2086_p0), 1, %s1730_s19  }
  0x4d   : > { %s1448_s13 = sshll.u32 (!%p2086_p0), %s1916_s6, 5  ;;  %s235_s7 = scalar_lea.sflag (!%p2086_p0), [#allocation3], %s1916_s6 }
  0x4e   : > { %s1920_s8 = scalar_lea.vmem (!%p2086_p0), [#allocation2], %s1448_s13  ;;  %p2087_p4 = scmp.ne.s32.totalorder (!%p2086_p0), %s2078_s24, 0 }
  0x51   : > { %1713 = dma.done.wait (%p2087_p4), %s235_s7, 512  }
  0x52   : > { %1715 = vsyncadd (%p2087_p4), %s235_s7, 4294966784  ;;  %p2088_p8 = scmp.eq.s32.totalorder %s1804_s22, 0 }
  0x54   : > { %1717 = dma.done.wait (%p2088_p8), [#allocation6], 32768   ;;  %p2089_p7 = pmov %p2088_p8 }
  0x55   : > { %v340_v0 = vld [vmem:[#allocation5 + $0x1e8] sm:$0xff]  ;;  %v339_v1 = vld [vmem:[#allocation5 + $0x1e0] sm:$0xff]  ;;  %s1451_s24 = sshll.u32 %s1916_s6, 6  ;;  %v1945_v28 = vld [vmem:[%s1920_s8 + $0x18] sm:$0xff]  ;;  %vm1748_vm0 = vmmov 0   ;;  %vm568_vm1 = vcmask 130048  }
  0x56   : > { %1719 = vsyncadd (%p2089_p7), [#allocation6], 4294934528  ;;  %v336_v2 = vld [vmem:[#allocation5 + $0x1c8] sm:$0xff]  ;;  %407 = vmatprep.subr.mxu0 %v340_v0  ;;  %v335_v3 = vld [vmem:[#allocation5 + $0x1c0] sm:$0xff]  ;;  %s1938_s26 = scalar_lea.vmem [#allocation8], %s1451_s24  ;;  %s1471_s12 = sshll.u32 %s1804_s22, 10 }
  0x57   : > { %408 = vmatpush1.msra.mxu0 %v339_v1  ;;  %v332_v4 = vld [vmem:[#allocation5 + $0x1a8] sm:$0xff]  ;;  %v331_v5 = vld [vmem:[#allocation5 + $0x1a0] sm:$0xff]  ;;  %v1948_v29 = vld [vmem:[%s1920_s8 + $0x10] sm:$0xff]  ;;  %1330 = vst [vmem:[%s1938_s26 + $0x18] sm:$0xff] %v1945_v28  ;;  %s1346_s15 = sshll.u32 %s1938_s26, 4  ;;  %s2020_s30 = scalar_lea.hbm %s2072_s5, %s1471_s12  ;;  %s2022_s15 = int_to_ptr.vmem [resolvable:$true] %s1346_s15 }
  0x58   : > { %409 = vmatprep.subr.mxu0 %v336_v2  ;;  %v328_v6 = vld [vmem:[#allocation5 + $0x188] sm:$0xff]  ;;  %v327_v7 = vld [vmem:[#allocation5 + $0x180] sm:$0xff]  ;;  %v342_v30 = vld [vmem:[#allocation5 + $0x1f8] sm:$0xff]  ;;  %1329 = vst [vmem:[%s1938_s26 + $0x10] sm:$0xff] %v1948_v29  ;;  %s1332_s22 = scalar_lea.sflag [#allocation4], %s1916_s6  ;;  %s1670_s11 = scalar_lea.vmem %s2022_s15, 1024 }
  0x59   : > { %410 = vmatpush1.msra.mxu0 %v335_v3  ;;  %v324_v8 = vld [vmem:[#allocation5 + $0x168] sm:$0xff]  ;;  %v323_v9 = vld [vmem:[#allocation5 + $0x160] sm:$0xff]  ;;  %484 = vmatprep.subr.mxu1 %v342_v30  ;;  %v341_v31 = vld [vmem:[#allocation5 + $0x1f0] sm:$0xff]  ;;  %p1671_p11 = scmp.ne.s32.totalorder %s2022_s15, %s1670_s11  ;;  %p2090_p10 = scmp.ne.s32.totalorder %s2083_s29, 0 }
  0x5a   : > { %411 = vmatprep.subr.mxu0 %v332_v4  ;;  %v320_v10 = vld [vmem:[#allocation5 + $0x148] sm:$0xff]  ;;  %v319_v11 = vld [vmem:[#allocation5 + $0x140] sm:$0xff]  ;;  %v338_v32 = vld [vmem:[#allocation5 + $0x1d8] sm:$0xff]  ;;  %485 = vmatpush1.msra.mxu1 %v341_v31  ;;  %s1750_s27 = smov [#allocation8]  }
  0x5b   : > { %412 = vmatpush1.msra.mxu0 %v331_v5  ;;  %v316_v12 = vld [vmem:[#allocation5 + $0x128] sm:$0xff]  ;;  %v315_v13 = vld [vmem:[#allocation5 + $0x120] sm:$0xff]  ;;  %v337_v33 = vld [vmem:[#allocation5 + $0x1d0] sm:$0xff]  ;;  %486 = vmatprep.subr.mxu1 %v338_v32  ;;  %p1672_p1 = pnand %p1671_p11, %p2090_p10  ;;  %s1674_s23 = sshll.u32 %s1750_s27, 4  ;;  %s1675_s23 = int_to_ptr.vmem [resolvable:$false] %s1674_s23 }
  0x5c   : > { %413 = vmatprep.subr.mxu0 %v328_v6  ;;  %v312_v14 = vld [vmem:[#allocation5 + $0x108] sm:$0xff]  ;;  %v311_v15 = vld [vmem:[#allocation5 + $0x100] sm:$0xff]  ;;  %v334_v35 = vld [vmem:[#allocation5 + $0x1b8] sm:$0xff]  ;;  %487 = vmatpush1.msra.mxu1 %v337_v33  ;;  %s1676_s13 = scalar_lea.vmem %s1675_s23, 2048  ;;  %p1677_p6 = scmp.lt.s32.totalorder %s2022_s15, %s1675_s23 }
  0x5d   : > { %414 = vmatpush1.msra.mxu0 %v327_v7  ;;  %v308_v16 = vld [vmem:[#allocation5 + $0xe8] sm:$0xff]  ;;  %v307_v17 = vld [vmem:[#allocation5 + $0xe0] sm:$0xff]  ;;  %v333_v37 = vld [vmem:[#allocation5 + $0x1b0] sm:$0xff]  ;;  %488 = vmatprep.subr.mxu1 %v334_v35  ;;  %p1673_p2 = pneg %p1672_p1  ;;  %p1678_p12 = scmp.lt.s32.totalorder %s1676_s13, %s1670_s11 }
  0x5e   : > { %415 = vmatprep.subr.mxu0 %v324_v8  ;;  %v304_v18 = vld [vmem:[#allocation5 + $0xc8] sm:$0xff]  ;;  %v303_v19 = vld [vmem:[#allocation5 + $0xc0] sm:$0xff]  ;;  %v330_v39 = vld [vmem:[#allocation5 + $0x198] sm:$0xff]  ;;  %489 = vmatpush1.msra.mxu1 %v333_v37 }
  0x5f   : > { %416 = vmatpush1.msra.mxu0 %v323_v9  ;;  %v300_v20 = vld [vmem:[#allocation5 + $0xa8] sm:$0xff]  ;;  %v299_v21 = vld [vmem:[#allocation5 + $0xa0] sm:$0xff]  ;;  %v329_v41 = vld [vmem:[#allocation5 + $0x190] sm:$0xff]  ;;  %490 = vmatprep.subr.mxu1 %v330_v39  ;;  %p1679_p3 = por %p1678_p12, %p1677_p6 }
  0x60   : > { %417 = vmatprep.subr.mxu0 %v320_v10  ;;  %v296_v22 = vld [vmem:[#allocation5 + $0x88] sm:$0xff]  ;;  %v295_v23 = vld [vmem:[#allocation5 + $0x80] sm:$0xff]  ;;  %v326_v43 = vld [vmem:[#allocation5 + $0x178] sm:$0xff]  ;;  %491 = vmatpush1.msra.mxu1 %v329_v41 }
  0x61   : > { %418 = vmatpush1.msra.mxu0 %v319_v11  ;;  %v292_v24 = vld [vmem:[#allocation5 + $0x68] sm:$0xff]  ;;  %v291_v25 = vld [vmem:[#allocation5 + $0x60] sm:$0xff]  ;;  %v325_v45 = vld [vmem:[#allocation5 + $0x170] sm:$0xff]  ;;  %492 = vmatprep.subr.mxu1 %v326_v43  ;;  %p1680_p9 = pnand %p1679_p3, %p1673_p2 }
  0x62   : > { %419 = vmatprep.subr.mxu0 %v316_v12  ;;  %v1932_v26 = vld [vmem:[%s1920_s8 + $0x8] sm:$0xff]  ;;  %v1935_v27 = vld [vmem:[%s1920_s8] sm:$0xff]  ;;  %v322_v47 = vld [vmem:[#allocation5 + $0x158] sm:$0xff]  ;;  %493 = vmatpush1.msra.mxu1 %v325_v45 }
  0x63   : > { %420 = vmatpush1.msra.mxu0 %v315_v13  ;;  %471 = vmatprep.mubr.f32.mxu0 %v1932_v26  ;;  %1328 = vst [vmem:[%s1938_s26 + $0x8] sm:$0xff] %v1932_v26  ;;  %1327 = vst [vmem:[%s1938_s26] sm:$0xff] %v1935_v27  ;;  %v288_v34 = vld [vmem:[#allocation5 + $0x48] sm:$0xff]  ;;  %v287_v36 = vld [vmem:[#allocation5 + $0x40] sm:$0xff] }
  0x64   : > { %421 = vmatprep.subr.mxu0 %v312_v14  ;;  %v284_v38 = vld [vmem:[#allocation5 + $0x28] sm:$0xff]  ;;  %v283_v40 = vld [vmem:[#allocation5 + $0x20] sm:$0xff]  ;;  %v321_v49 = vld [vmem:[#allocation5 + $0x150] sm:$0xff]  ;;  %494 = vmatprep.subr.mxu1 %v322_v47 }
  0x65   : > { %422 = vmatpush1.msra.mxu0 %v311_v15  ;;  %v280_v42 = vld [vmem:[#allocation5 + $0x8] sm:$0xff]  ;;  %v279_v44 = vld [vmem:[#allocation5] sm:$0xff]  ;;  %v318_v51 = vld [vmem:[#allocation5 + $0x138] sm:$0xff]  ;;  %495 = vmatpush1.msra.mxu1 %v321_v49 }
  0x66   : > { %423 = vmatprep.subr.mxu0 %v308_v16  ;;  %v404_v46 = vld [vmem:[#allocation5 + $0x3e8] sm:$0xff]  ;;  %v403_v48 = vld [vmem:[#allocation5 + $0x3e0] sm:$0xff]  ;;  %v317_v53 = vld [vmem:[#allocation5 + $0x130] sm:$0xff]  ;;  %496 = vmatprep.subr.mxu1 %v318_v51 }
  0x67   : > { %424 = vmatpush1.msra.mxu0 %v307_v17  ;;  %v400_v50 = vld [vmem:[#allocation5 + $0x3c8] sm:$0xff]  ;;  %v399_v52 = vld [vmem:[#allocation5 + $0x3c0] sm:$0xff]  ;;  %v314_v55 = vld [vmem:[#allocation5 + $0x118] sm:$0xff]  ;;  %497 = vmatpush1.msra.mxu1 %v317_v53 }
  0x68   : > { %425 = vmatprep.subr.mxu0 %v304_v18  ;;  %v396_v54 = vld [vmem:[#allocation5 + $0x3a8] sm:$0xff]  ;;  %v395_v56 = vld [vmem:[#allocation5 + $0x3a0] sm:$0xff]  ;;  %v313_v57 = vld [vmem:[#allocation5 + $0x110] sm:$0xff]  ;;  %498 = vmatprep.subr.mxu1 %v314_v55 }
  0x69   : > { %426 = vmatpush1.msra.mxu0 %v303_v19  ;;  %v392_v58 = vld [vmem:[#allocation5 + $0x388] sm:$0xff]  ;;  %v310_v59 = vld [vmem:[#allocation5 + $0xf8] sm:$0xff]  ;;  %v391_v60 = vld [vmem:[#allocation5 + $0x380] sm:$0xff]  ;;  %499 = vmatpush1.msra.mxu1 %v313_v57 }
  0x6a   : > { %427 = vmatprep.subr.mxu0 %v300_v20  ;;  %v309_v61 = vld [vmem:[#allocation5 + $0xf0] sm:$0xff]  ;;  %v388_v62 = vld [vmem:[#allocation5 + $0x368] sm:$0xff]  ;;  %v306_v63 = vld [vmem:[#allocation5 + $0xd8] sm:$0xff]  ;;  %500 = vmatprep.subr.mxu1 %v310_v59 }
  0x6b   : > { %428 = vmatpush1.msra.mxu0 %v299_v21  ;;  %v387_v0 = vld [vmem:[#allocation5 + $0x360] sm:$0xff]  ;;  %v305_v1 = vld [vmem:[#allocation5 + $0xd0] sm:$0xff]  ;;  %v384_v2 = vld [vmem:[#allocation5 + $0x348] sm:$0xff]  ;;  %501 = vmatpush1.msra.mxu1 %v309_v61 }
  0x6c   : > { %429 = vmatprep.subr.mxu0 %v296_v22  ;;  %v302_v3 = vld [vmem:[#allocation5 + $0xb8] sm:$0xff]  ;;  %v383_v4 = vld [vmem:[#allocation5 + $0x340] sm:$0xff]  ;;  %502 = vmatprep.subr.mxu1 %v306_v63  ;;  %v301_v5 = vld [vmem:[#allocation5 + $0xb0] sm:$0xff] }
  0x6d   : > { %430 = vmatpush1.msra.mxu0 %v295_v23  ;;  %v380_v6 = vld [vmem:[#allocation5 + $0x328] sm:$0xff]  ;;  %503 = vmatpush1.msra.mxu1 %v305_v1  ;;  %v298_v7 = vld [vmem:[#allocation5 + $0x98] sm:$0xff]  ;;  %v379_v8 = vld [vmem:[#allocation5 + $0x320] sm:$0xff] }
  0x6e   : > { %431 = vmatprep.subr.mxu0 %v292_v24  ;;  %504 = vmatprep.subr.mxu1 %v302_v3  ;;  %v297_v9 = vld [vmem:[#allocation5 + $0x90] sm:$0xff]  ;;  %v376_v10 = vld [vmem:[#allocation5 + $0x308] sm:$0xff]  ;;  %v294_v11 = vld [vmem:[#allocation5 + $0x78] sm:$0xff] }
  0x6f   : > { %432 = vmatpush1.msra.mxu0 %v291_v25  ;;  %505 = vmatpush1.msra.mxu1 %v301_v5  ;;  %v375_v12 = vld [vmem:[#allocation5 + $0x300] sm:$0xff]  ;;  %v293_v13 = vld [vmem:[#allocation5 + $0x70] sm:$0xff]  ;;  %v372_v14 = vld [vmem:[#allocation5 + $0x2e8] sm:$0xff] }
  0x70   : > { %433 = vmatprep.subr.mxu0 %v288_v34  ;;  %506 = vmatprep.subr.mxu1 %v298_v7  ;;  %v290_v15 = vld [vmem:[#allocation5 + $0x58] sm:$0xff]  ;;  %v371_v16 = vld [vmem:[#allocation5 + $0x2e0] sm:$0xff]  ;;  %v289_v17 = vld [vmem:[#allocation5 + $0x50] sm:$0xff]  ;;  %v1747_v7 = vmov 0.0  }
  0x71   : > { %434 = vmatpush1.msra.mxu0 %v287_v36  ;;  %507 = vmatpush1.msra.mxu1 %v297_v9  ;;  %v368_v18 = vld [vmem:[#allocation5 + $0x2c8] sm:$0xff]  ;;  %v286_v19 = vld [vmem:[#allocation5 + $0x38] sm:$0xff]  ;;  %v367_v20 = vld [vmem:[#allocation5 + $0x2c0] sm:$0xff] }
  0x72   : > { %435 = vmatprep.subr.mxu0 %v284_v38  ;;  %508 = vmatprep.subr.mxu1 %v294_v11  ;;  %v285_v21 = vld [vmem:[#allocation5 + $0x30] sm:$0xff]  ;;  %v364_v22 = vld [vmem:[#allocation5 + $0x2a8] sm:$0xff]  ;;  %v282_v23 = vld [vmem:[#allocation5 + $0x18] sm:$0xff] }
  0x73   : > { %436 = vmatpush1.msra.mxu0 %v283_v40  ;;  %509 = vmatpush1.msra.mxu1 %v293_v13  ;;  %v363_v24 = vld [vmem:[#allocation5 + $0x2a0] sm:$0xff]  ;;  %v281_v25 = vld [vmem:[#allocation5 + $0x10] sm:$0xff]  ;;  %v360_v30 = vld [vmem:[#allocation5 + $0x288] sm:$0xff] }
  0x74   : > { %437 = vmatprep.subr.mxu0 %v280_v42  ;;  %510 = vmatprep.subr.mxu1 %v290_v15  ;;  %v406_v31 = vld [vmem:[#allocation5 + $0x3f8] sm:$0xff]  ;;  %v359_v32 = vld [vmem:[#allocation5 + $0x280] sm:$0xff]  ;;  %v405_v33 = vld [vmem:[#allocation5 + $0x3f0] sm:$0xff] }
  0x75   : > { %438 = vmatpush1.msra.mxu0 %v279_v44  ;;  %511 = vmatpush1.msra.mxu1 %v289_v17  ;;  %v356_v34 = vld [vmem:[#allocation5 + $0x268] sm:$0xff]  ;;  %v402_v35 = vld [vmem:[#allocation5 + $0x3d8] sm:$0xff]  ;;  %v355_v36 = vld [vmem:[#allocation5 + $0x260] sm:$0xff] }
  0x76   : > { %439 = vmatprep.subr.mxu0 %v404_v46  ;;  %512 = vmatprep.subr.mxu1 %v286_v19  ;;  %v401_v37 = vld [vmem:[#allocation5 + $0x3d0] sm:$0xff]  ;;  %v352_v38 = vld [vmem:[#allocation5 + $0x248] sm:$0xff]  ;;  %v398_v39 = vld [vmem:[#allocation5 + $0x3b8] sm:$0xff] }
  0x77   : > { %440 = vmatpush2.msra.mxu0 %v403_v48  ;;  %513 = vmatpush1.msra.mxu1 %v285_v21  ;;  %v351_v40 = vld [vmem:[#allocation5 + $0x240] sm:$0xff]  ;;  %v397_v41 = vld [vmem:[#allocation5 + $0x3b0] sm:$0xff]  ;;  %v348_v42 = vld [vmem:[#allocation5 + $0x228] sm:$0xff] }
  0x78   : > { %441 = vmatprep.subr.mxu0 %v400_v50  ;;  %514 = vmatprep.subr.mxu1 %v282_v23  ;;  %v394_v43 = vld [vmem:[#allocation5 + $0x398] sm:$0xff]  ;;  %v347_v44 = vld [vmem:[#allocation5 + $0x220] sm:$0xff]  ;;  %v393_v45 = vld [vmem:[#allocation5 + $0x390] sm:$0xff] }
  0x79   : > { %442 = vmatpush2.msra.mxu0 %v399_v52  ;;  %515 = vmatpush1.msra.mxu1 %v281_v25  ;;  %v344_v46 = vld [vmem:[#allocation5 + $0x208] sm:$0xff]  ;;  %v390_v47 = vld [vmem:[#allocation5 + $0x378] sm:$0xff]  ;;  %v343_v48 = vld [vmem:[#allocation5 + $0x200] sm:$0xff] }
  0x7a   : > { %443 = vmatprep.subr.mxu0 %v396_v54  ;;  %516 = vmatprep.subr.mxu1 %v406_v31  ;;  %v389_v49 = vld [vmem:[#allocation5 + $0x370] sm:$0xff]  ;;  %v386_v50 = vld [vmem:[#allocation5 + $0x358] sm:$0xff]  ;;  %v561_v11 = vld [vmem:[%s2070_s3] sm:$0xf] }
  0x7b   : > { %444 = vmatpush2.msra.mxu0 %v395_v56  ;;  %517 = vmatpush2.msra.mxu1 %v405_v33  ;;  %v385_v51 = vld [vmem:[#allocation5 + $0x350] sm:$0xff]  ;;  %v382_v52 = vld [vmem:[#allocation5 + $0x338] sm:$0xff]  ;;  %v861_v21 = vld [vmem:[#allocation7 + $0x1e8] sm:$0xff] }
  0x7c   : > { %445 = vmatprep.subr.mxu0 %v392_v58  ;;  %518 = vmatprep.subr.mxu1 %v402_v35  ;;  %v381_v53 = vld [vmem:[#allocation5 + $0x330] sm:$0xff]  ;;  %v378_v54 = vld [vmem:[#allocation5 + $0x318] sm:$0xff]  ;;  %v860_v23 = vld [vmem:[#allocation7 + $0x1e0] sm:$0xff] }
  0x7d   : > { %446 = vmatpush2.msra.mxu0 %v391_v60  ;;  %519 = vmatpush2.msra.mxu1 %v401_v37  ;;  %v377_v55 = vld [vmem:[#allocation5 + $0x310] sm:$0xff]  ;;  %v374_v56 = vld [vmem:[#allocation5 + $0x2f8] sm:$0xff]  ;;  %v857_v33 = vld [vmem:[#allocation7 + $0x1c8] sm:$0xff] }
  0x7e   : > { %447 = vmatprep.subr.mxu0 %v388_v62  ;;  %520 = vmatprep.subr.mxu1 %v398_v39  ;;  %v373_v57 = vld [vmem:[#allocation5 + $0x2f0] sm:$0xff]  ;;  %v370_v58 = vld [vmem:[#allocation5 + $0x2d8] sm:$0xff]  ;;  %v856_v35 = vld [vmem:[#allocation7 + $0x1c0] sm:$0xff] }
  0x7f   : > { %448 = vmatpush2.msra.mxu0 %v387_v0  ;;  %521 = vmatpush2.msra.mxu1 %v397_v41  ;;  %v369_v59 = vld [vmem:[#allocation5 + $0x2d0] sm:$0xff]  ;;  %v366_v60 = vld [vmem:[#allocation5 + $0x2b8] sm:$0xff]  ;;  %v853_v41 = vld [vmem:[#allocation7 + $0x1a8] sm:$0xff] }
  0x80   : > { %449 = vmatprep.subr.mxu0 %v384_v2  ;;  %522 = vmatprep.subr.mxu1 %v394_v43  ;;  %v365_v61 = vld [vmem:[#allocation5 + $0x2b0] sm:$0xff]  ;;  %v362_v62 = vld [vmem:[#allocation5 + $0x298] sm:$0xff]  ;;  %v852_v43 = vld [vmem:[#allocation7 + $0x1a0] sm:$0xff] }
  0x81   : > { %450 = vmatpush2.msra.mxu0 %v383_v4  ;;  %523 = vmatpush2.msra.mxu1 %v393_v45  ;;  %v361_v63 = vld [vmem:[#allocation5 + $0x290] sm:$0xff]  ;;  %v354_v1 = vld [vmem:[#allocation5 + $0x258] sm:$0xff] }
  0x82   : > { %451 = vmatprep.subr.mxu0 %v380_v6  ;;  %524 = vmatprep.subr.mxu1 %v390_v47  ;;  %v357_v0 = vld [vmem:[#allocation5 + $0x270] sm:$0xff]  ;;  %v350_v3 = vld [vmem:[#allocation5 + $0x238] sm:$0xff] }
  0x83   : > { %452 = vmatpush2.msra.mxu0 %v379_v8  ;;  %525 = vmatpush2.msra.mxu1 %v389_v49  ;;  %v353_v2 = vld [vmem:[#allocation5 + $0x250] sm:$0xff]  ;;  %v346_v5 = vld [vmem:[#allocation5 + $0x218] sm:$0xff]  ;;  %v1749_v8 = vmov 0   ;;  %v849_v49 = vld [vmem:[#allocation7 + $0x188] sm:$0xff] }
  0x84   : > { %453 = vmatprep.subr.mxu0 %v376_v10  ;;  %526 = vmatprep.subr.mxu1 %v386_v50  ;;  %v349_v4 = vld [vmem:[#allocation5 + $0x230] sm:$0xff]  ;;  %v674_v13 = vld [vmem:[#allocation7 + $0xf8] sm:$0xff] }
  0x85   : > { %454 = vmatpush2.msra.mxu0 %v375_v12  ;;  %527 = vmatpush2.msra.mxu1 %v385_v51  ;;  %v345_v6 = vld [vmem:[#allocation5 + $0x210] sm:$0xff]  ;;  %v863_v17 = vld [vmem:[#allocation7 + $0x1f8] sm:$0xff]  ;;  %v848_v51 = vld [vmem:[#allocation7 + $0x180] sm:$0xff] }
  0x86   : > { %455 = vmatprep.subr.mxu0 %v372_v14  ;;  %528 = vmatprep.subr.mxu1 %v382_v52  ;;  %v1453_v14 = vld [vmem:[%s2070_s3 + $0x4] sm:$0xf]  ;;  %v673_v15 = vld [vmem:[#allocation7 + $0xf0] sm:$0xff]  ;;  %v859_v25 = vld [vmem:[#allocation7 + $0x1d8] sm:$0xff] }
  0x87   : > { %456 = vmatpush2.msra.mxu0 %v371_v16  ;;  %548 = vmatprep.mubr.f32.mxu1 %v1932_v26  ;;  %v358_v26 = vld [vmem:[#allocation5 + $0x278] sm:$0xff]  ;;  %v672_v16 = vld [vmem:[#allocation7 + $0xe8] sm:$0xff]  ;;  %v862_v19 = vld [vmem:[#allocation7 + $0x1f0] sm:$0xff] }
  0x88   : > { %457 = vmatprep.subr.mxu0 %v368_v18  ;;  %529 = vmatpush2.msra.mxu1 %v381_v53  ;;  %v671_v18 = vld [vmem:[#allocation7 + $0xe0] sm:$0xff]  ;;  %v858_v31 = vld [vmem:[#allocation7 + $0x1d0] sm:$0xff]  ;;  %v855_v37 = vld [vmem:[#allocation7 + $0x1b8] sm:$0xff] }
  0x89   : > { %458 = vmatpush2.msra.mxu0 %v367_v20  ;;  %530 = vmatprep.subr.mxu1 %v378_v54  ;;  %v670_v20 = vld [vmem:[#allocation7 + $0xd8] sm:$0xff]  ;;  %v854_v39 = vld [vmem:[#allocation7 + $0x1b0] sm:$0xff]  ;;  %v656_v52 = vld [vmem:[#allocation7 + $0x68] sm:$0xff] }
  0x8a   : > { %459 = vmatprep.subr.mxu0 %v364_v22  ;;  %531 = vmatpush2.msra.mxu1 %v377_v55  ;;  %v669_v22 = vld [vmem:[#allocation7 + $0xd0] sm:$0xff]  ;;  %v851_v45 = vld [vmem:[#allocation7 + $0x198] sm:$0xff]  ;;  %v655_v54 = vld [vmem:[#allocation7 + $0x60] sm:$0xff] }
  0x8b   : > { %460 = vmatpush2.msra.mxu0 %v363_v24  ;;  %532 = vmatprep.subr.mxu1 %v374_v56  ;;  %v668_v24 = vld [vmem:[#allocation7 + $0xc8] sm:$0xff]  ;;  %v850_v47 = vld [vmem:[#allocation7 + $0x190] sm:$0xff]  ;;  %v847_v53 = vld [vmem:[#allocation7 + $0x178] sm:$0xff] }
  0x8c   : > { %461 = vmatprep.subr.mxu0 %v360_v30  ;;  %533 = vmatpush2.msra.mxu1 %v373_v57  ;;  %v667_v30 = vld [vmem:[#allocation7 + $0xc0] sm:$0xff]  ;;  %v657_v50 = vld [vmem:[#allocation7 + $0x70] sm:$0xff]  ;;  %v654_v56 = vld [vmem:[#allocation7 + $0x58] sm:$0xff] }
  0x8d   : > { %462 = vmatpush2.msra.mxu0 %v359_v32  ;;  %534 = vmatprep.subr.mxu1 %v370_v58  ;;  %v666_v32 = vld [vmem:[#allocation7 + $0xb8] sm:$0xff]  ;;  %v846_v55 = vld [vmem:[#allocation7 + $0x170] sm:$0xff]  ;;  %v845_v57 = vld [vmem:[#allocation7 + $0x168] sm:$0xff] }
  0x8e   : > { %463 = vmatprep.subr.mxu0 %v356_v34  ;;  %535 = vmatpush2.msra.mxu1 %v369_v59  ;;  %v665_v34 = vld [vmem:[#allocation7 + $0xb0] sm:$0xff]  ;;  %v844_v59 = vld [vmem:[#allocation7 + $0x160] sm:$0xff] }
  0x8f   : > { %464 = vmatpush2.msra.mxu0 %v355_v36  ;;  %536 = vmatprep.subr.mxu1 %v366_v60  ;;  %v664_v36 = vld [vmem:[#allocation7 + $0xa8] sm:$0xff]  ;;  %v653_v58 = vld [vmem:[#allocation7 + $0x50] sm:$0xff] }
  0x90   : > { %465 = vmatprep.subr.mxu0 %v352_v38  ;;  %537 = vmatpush2.msra.mxu1 %v365_v61  ;;  %v663_v38 = vld [vmem:[#allocation7 + $0xa0] sm:$0xff]  ;;  %v652_v60 = vld [vmem:[#allocation7 + $0x48] sm:$0xff]  ;;  %v843_v61 = vld [vmem:[#allocation7 + $0x158] sm:$0xff] }
  0x91   : > { %466 = vmatpush2.msra.mxu0 %v351_v40  ;;  %538 = vmatprep.subr.mxu1 %v362_v62  ;;  %v662_v40 = vld [vmem:[#allocation7 + $0x98] sm:$0xff]  ;;  %v651_v62 = vld [vmem:[#allocation7 + $0x40] sm:$0xff] }
  0x92   : > { %467 = vmatprep.subr.mxu0 %v348_v42  ;;  %539 = vmatpush2.msra.mxu1 %v361_v63  ;;  %v661_v42 = vld [vmem:[#allocation7 + $0x90] sm:$0xff] }
  0x93   : > { %468 = vmatpush2.msra.mxu0 %v347_v44  ;;  %540 = vmatprep.subr.mxu1 %v358_v26  ;;  %v660_v44 = vld [vmem:[#allocation7 + $0x88] sm:$0xff]  ;;  %v842_v63 = vld [vmem:[#allocation7 + $0x150] sm:$0xff]  ;;  %v650_v26 = vld [vmem:[#allocation7 + $0x38] sm:$0xff] }
  0x94   : > { %469 = vmatprep.subr.mxu0 %v344_v46  ;;  %541 = vmatpush2.msra.mxu1 %v357_v0  ;;  %v659_v46 = vld [vmem:[#allocation7 + $0x80] sm:$0xff]  ;;  %v841_v0 = vld [vmem:[#allocation7 + $0x148] sm:$0xff] }
  0x95   : > { %470 = vmatpush2.msra.mxu0 %v343_v48  ;;  %542 = vmatprep.subr.mxu1 %v354_v1  ;;  %v658_v48 = vld [vmem:[#allocation7 + $0x78] sm:$0xff]  ;;  %v649_v1 = vld [vmem:[#allocation7 + $0x30] sm:$0xff] }
  0x96   : > { %472 = vmatmul.mubr.f32.vlgmr.msra.gmra.mxu0 %v1935_v27  ;;  %543 = vmatpush2.msra.mxu1 %v353_v2  ;;  %v840_v2 = vld [vmem:[#allocation7 + $0x140] sm:$0xff] }
  0x97   : > { %477 = vmatprep.mubr.f32.mxu0 %v1945_v28  ;;  %544 = vmatprep.subr.mxu1 %v350_v3  ;;  %v648_v3 = vld [vmem:[#allocation7 + $0x28] sm:$0xff] }
  0x98   : > { %545 = vmatpush2.msra.mxu1 %v349_v4  ;;  %1491 = vmatprep.subr.mxu0 %v1747_v7  ;;  %v839_v4 = vld [vmem:[#allocation7 + $0x138] sm:$0xff] }
  0x99   : > { %546 = vmatprep.subr.mxu1 %v346_v5  ;;  %1588 = vset.pattern.permute.xlu0 %v1749_v8  ;;  %v647_v5 = vld [vmem:[#allocation7 + $0x20] sm:$0xff] }
  0x9a   : > { %478 = vmatmul.mubr.f32.gmra.mxu0 %v1948_v29  ;;  %547 = vmatpush2.msra.mxu1 %v345_v6  ;;  %v838_v6 = vld [vmem:[#allocation7 + $0x130] sm:$0xff] }
  0x9b   : > { %549 = vmatmul.mubr.f32.vlgmr.msra.gmra.mxu1 %v1935_v27  ;;  %1484 = vmatprep.subr.mxu1 %v1747_v7  ;;  %v1454_v27 = vld [vmem:[%s2071_s4 + $0x4] sm:$0xf] }
  0x9c   : > { %554 = vmatprep.mubr.f32.mxu1 %v1945_v28  ;;  %1495 = vmatprep.mubr.msk.f32.mxu0 %vm1748_vm0, %v1747_v7  ;;  %v562_v28 = vld [vmem:[%s2071_s4] sm:$0xf] }
  0x9d   : > { %1589 = vset.pattern.permute.xlu1 %v1749_v8  ;;  %754 = vperm.xlu0 %1588, %v1454_v27   ;;  %v646_v27 = vld [vmem:[#allocation7 + $0x18] sm:$0xff]  ;;  %v837_v8 = vld [vmem:[#allocation7 + $0x128] sm:$0xff] }
  0x9f   : > { %555 = vmatmul.mubr.f32.gmra.mxu1 %v1948_v29 }
  0xa0   : > { %1488 = vmatprep.mubr.msk.f32.mxu1 %vm1748_vm0, %v1747_v7 }
  0xa1   : > { %565 = vperm.xlu0 %1588, %v562_v28   ;;  %v645_v28 = vld [vmem:[#allocation7 + $0x10] sm:$0xff] }
 0x156   : > { %v473_v29 = vpop.f32.mrf.mxu0 }
 0x158   : > { %v475_v9 = vpop.f32.mrf.mxu0 }
 0x15a   : > { %v479_v10 = vpop.f32.mrf.mxu0 }
 0x15b   : > { %1485 = vmatpush3.msra.mxu1 %v479_v10  ;;  %v835_v10 = vld [vmem:[#allocation7 + $0x118] sm:$0xff] }
 0x15c   : > { %v481_v12 = vpop.f32.mrf.mxu0  ;;  %1486 = vmatprep.subr.mxu1 %v1747_v7 }
 0x15d   : > { %1487 = vmatpush3.msra.mxu1 %v473_v29  ;;  %1492 = vmatpush3.msra.mxu0 %v481_v12  ;;  %v836_v29 = vld [vmem:[#allocation7 + $0x120] sm:$0xff]  ;;  %v834_v12 = vld [vmem:[#allocation7 + $0x110] sm:$0xff] }
 0x15e   : > { %1489 = vmatmul.mubr.msk.f32.vlgmr.msra.gmra.mxu1 %vm568_vm1, %v561_v11  ;;  %1493 = vmatprep.subr.mxu0 %v1747_v7  ;;  %v643_v11 = vld [vmem:[#allocation7] sm:$0xff] }
 0x15f   : > { %1494 = vmatpush3.msra.mxu0 %v475_v9  ;;  %675 = vmatprep.subr.mxu1 %v674_v13  ;;  %v644_v9 = vld [vmem:[#allocation7 + $0x8] sm:$0xff] }
 0x160   : > { %1496 = vmatmul.mubr.msk.f32.vlgmr.msra.gmra.mxu0 %vm568_vm1, %v1453_v14  ;;  %676 = vmatpush1.msra.mxu1 %v673_v15  ;;  %v833_v13 = vld [vmem:[#allocation7 + $0x108] sm:$0xff]  ;;  %v832_v14 = vld [vmem:[#allocation7 + $0x100] sm:$0xff] }
 0x161   : > { %677 = vmatprep.subr.mxu1 %v672_v16  ;;  %864 = vmatprep.subr.mxu0 %v863_v17  ;;  %v1460_v15 = vld [vmem:[%s2071_s4 + $0xc] sm:$0xf]  ;;  %v1457_v16 = vld [vmem:[%s2071_s4 + $0x8] sm:$0xf]  ;;  %v550_v17 = vpop.f32.mrf.mxu1 }
 0x162   : > { %678 = vmatpush1.msra.mxu1 %v671_v18  ;;  %865 = vmatpush1.msra.mxu0 %v862_v19  ;;  %v755_v19 = vpop.permute.xlu0 %754 }
 0x163   : > { %679 = vmatprep.subr.mxu1 %v670_v20  ;;  %866 = vmatprep.subr.mxu0 %v861_v21  ;;  %v552_v18 = vpop.f32.mrf.mxu1 }
 0x164   : > { %680 = vmatpush1.msra.mxu1 %v669_v22  ;;  %867 = vmatpush1.msra.mxu0 %v860_v23 }
 0x165   : > { %681 = vmatprep.subr.mxu1 %v668_v24  ;;  %868 = vmatprep.subr.mxu0 %v859_v25  ;;  %v556_v20 = vpop.f32.mrf.mxu1 }
 0x166   : > { %682 = vmatpush1.msra.mxu1 %v667_v30  ;;  %869 = vmatpush1.msra.mxu0 %v858_v31  ;;  %v566_v22 = vpop.permute.xlu0 %565 }
 0x167   : > { %683 = vmatprep.subr.mxu1 %v666_v32  ;;  %870 = vmatprep.subr.mxu0 %v857_v33  ;;  %v558_v21 = vpop.f32.mrf.mxu1 }
 0x168   : > { %684 = vmatpush1.msra.mxu1 %v665_v34  ;;  %871 = vmatpush1.msra.mxu0 %v856_v35  ;;  %v1456_v35 = vld [vmem:[%s2070_s3 + $0x8] sm:$0xf] }
 0x169   : > { %685 = vmatprep.subr.mxu1 %v664_v36  ;;  %872 = vmatprep.subr.mxu0 %v855_v37  ;;  %v1459_v36 = vld [vmem:[%s2070_s3 + $0xc] sm:$0xf]  ;;  %v1058_v37 = vld [vmem:[#allocation7 + $0x2f8] sm:$0xff] }
 0x16a   : > { %686 = vmatpush1.msra.mxu1 %v663_v38  ;;  %873 = vmatpush1.msra.mxu0 %v854_v39  ;;  %v1247_v38 = vld [vmem:[#allocation7 + $0x3f8] sm:$0xff]  ;;  %v1057_v39 = vld [vmem:[#allocation7 + $0x2f0] sm:$0xff] }
 0x16b   : > { %687 = vmatprep.subr.mxu1 %v662_v40  ;;  %874 = vmatprep.subr.mxu0 %v853_v41  ;;  %v1246_v40 = vld [vmem:[#allocation7 + $0x3f0] sm:$0xff]  ;;  %v1056_v41 = vld [vmem:[#allocation7 + $0x2e8] sm:$0xff] }
 0x16c   : > { %688 = vmatpush1.msra.mxu1 %v661_v42  ;;  %875 = vmatpush1.msra.mxu0 %v852_v43  ;;  %v1245_v42 = vld [vmem:[#allocation7 + $0x3e8] sm:$0xff]  ;;  %v1055_v43 = vld [vmem:[#allocation7 + $0x2e0] sm:$0xff] }
 0x16d   : > { %689 = vmatprep.subr.mxu1 %v660_v44  ;;  %876 = vmatprep.subr.mxu0 %v851_v45  ;;  %v1244_v44 = vld [vmem:[#allocation7 + $0x3e0] sm:$0xff]  ;;  %v1054_v45 = vld [vmem:[#allocation7 + $0x2d8] sm:$0xff] }
 0x16e   : > { %690 = vmatpush1.msra.mxu1 %v659_v46  ;;  %877 = vmatpush1.msra.mxu0 %v850_v47  ;;  %v1243_v46 = vld [vmem:[#allocation7 + $0x3d8] sm:$0xff]  ;;  %v1053_v47 = vld [vmem:[#allocation7 + $0x2d0] sm:$0xff] }
 0x16f   : > { %691 = vmatprep.subr.mxu1 %v658_v48  ;;  %878 = vmatprep.subr.mxu0 %v849_v49  ;;  %v1242_v48 = vld [vmem:[#allocation7 + $0x3d0] sm:$0xff]  ;;  %v1052_v49 = vld [vmem:[#allocation7 + $0x2c8] sm:$0xff] }
 0x170   : > { %692 = vmatpush1.msra.mxu1 %v657_v50  ;;  %879 = vmatpush1.msra.mxu0 %v848_v51  ;;  %v1241_v50 = vld [vmem:[#allocation7 + $0x3c8] sm:$0xff]  ;;  %v1051_v51 = vld [vmem:[#allocation7 + $0x2c0] sm:$0xff] }
 0x171   : > { %693 = vmatprep.subr.mxu1 %v656_v52  ;;  %880 = vmatprep.subr.mxu0 %v847_v53  ;;  %v1240_v52 = vld [vmem:[#allocation7 + $0x3c0] sm:$0xff]  ;;  %v1050_v53 = vld [vmem:[#allocation7 + $0x2b8] sm:$0xff] }
 0x172   : > { %694 = vmatpush1.msra.mxu1 %v655_v54  ;;  %881 = vmatpush1.msra.mxu0 %v846_v55  ;;  %v1239_v54 = vld [vmem:[#allocation7 + $0x3b8] sm:$0xff]  ;;  %v1049_v55 = vld [vmem:[#allocation7 + $0x2b0] sm:$0xff] }
 0x173   : > { %695 = vmatprep.subr.mxu1 %v654_v56  ;;  %882 = vmatprep.subr.mxu0 %v845_v57  ;;  %v1238_v56 = vld [vmem:[#allocation7 + $0x3b0] sm:$0xff]  ;;  %v1048_v57 = vld [vmem:[#allocation7 + $0x2a8] sm:$0xff] }
 0x174   : > { %696 = vmatpush1.msra.mxu1 %v653_v58  ;;  %883 = vmatpush1.msra.mxu0 %v844_v59  ;;  %v1237_v58 = vld [vmem:[#allocation7 + $0x3a8] sm:$0xff]  ;;  %v1047_v59 = vld [vmem:[#allocation7 + $0x2a0] sm:$0xff] }
 0x175   : > { %697 = vmatprep.subr.mxu1 %v652_v60  ;;  %884 = vmatprep.subr.mxu0 %v843_v61  ;;  %v1236_v60 = vld [vmem:[#allocation7 + $0x3a0] sm:$0xff]  ;;  %v1046_v61 = vld [vmem:[#allocation7 + $0x298] sm:$0xff] }
 0x176   : > { %698 = vmatpush1.msra.mxu1 %v651_v62  ;;  %885 = vmatpush1.msra.mxu0 %v842_v63  ;;  %v1235_v62 = vld [vmem:[#allocation7 + $0x398] sm:$0xff]  ;;  %v1045_v63 = vld [vmem:[#allocation7 + $0x290] sm:$0xff] }
 0x177   : > { %699 = vmatprep.subr.mxu1 %v650_v26  ;;  %886 = vmatprep.subr.mxu0 %v841_v0  ;;  %v1234_v26 = vld [vmem:[#allocation7 + $0x390] sm:$0xff]  ;;  %v1044_v0 = vld [vmem:[#allocation7 + $0x288] sm:$0xff] }
 0x178   : > { %700 = vmatpush1.msra.mxu1 %v649_v1  ;;  %887 = vmatpush1.msra.mxu0 %v840_v2  ;;  %v1233_v1 = vld [vmem:[#allocation7 + $0x388] sm:$0xff]  ;;  %v1043_v2 = vld [vmem:[#allocation7 + $0x280] sm:$0xff] }
 0x179   : > { %701 = vmatprep.subr.mxu1 %v648_v3  ;;  %888 = vmatprep.subr.mxu0 %v839_v4  ;;  %v1232_v3 = vld [vmem:[#allocation7 + $0x380] sm:$0xff]  ;;  %v1042_v4 = vld [vmem:[#allocation7 + $0x278] sm:$0xff] }
 0x17a   : > { %702 = vmatpush1.msra.mxu1 %v647_v5  ;;  %889 = vmatpush1.msra.mxu0 %v838_v6  ;;  %v1231_v5 = vld [vmem:[#allocation7 + $0x378] sm:$0xff]  ;;  %v1041_v6 = vld [vmem:[#allocation7 + $0x270] sm:$0xff] }
 0x17b   : > { %739 = vmatprep.mubr.f32.mxu1 %v1747_v7  ;;  %928 = vmatprep.mubr.f32.mxu0 %v1747_v7 }
 0x17c   : > { %703 = vmatprep.subr.mxu1 %v646_v27  ;;  %890 = vmatprep.subr.mxu0 %v837_v8  ;;  %v1230_v27 = vld [vmem:[#allocation7 + $0x370] sm:$0xff]  ;;  %v1040_v8 = vld [vmem:[#allocation7 + $0x268] sm:$0xff] }
 0x17d   : > { %704 = vmatpush1.msra.mxu1 %v645_v28  ;;  %891 = vmatpush1.msra.mxu0 %v836_v29  ;;  %v1229_v28 = vld [vmem:[#allocation7 + $0x368] sm:$0xff]  ;;  %v1039_v29 = vld [vmem:[#allocation7 + $0x260] sm:$0xff] }
 0x17e   : > { %705 = vmatprep.subr.mxu1 %v644_v9  ;;  %892 = vmatprep.subr.mxu0 %v835_v10  ;;  %v1228_v9 = vld [vmem:[#allocation7 + $0x360] sm:$0xff]  ;;  %v1038_v10 = vld [vmem:[#allocation7 + $0x258] sm:$0xff] }
 0x17f   : > { %706 = vmatpush1.msra.mxu1 %v643_v11  ;;  %893 = vmatpush1.msra.mxu0 %v834_v12  ;;  %v1227_v11 = vld [vmem:[#allocation7 + $0x358] sm:$0xff]  ;;  %v1037_v12 = vld [vmem:[#allocation7 + $0x250] sm:$0xff] }
 0x180   : > { %894 = vmatprep.subr.mxu0 %v833_v13  ;;  %1498 = vmatprep.subr.mxu1 %v1747_v7  ;;  %v1226_v13 = vld [vmem:[#allocation7 + $0x350] sm:$0xff] }
 0x181   : > { %895 = vmatpush1.msra.mxu0 %v832_v14  ;;  %1138 = vperm.xlu1 %1589, %v1460_v15   ;;  %v1036_v14 = vld [vmem:[#allocation7 + $0x248] sm:$0xff] }
 0x182   : > { %1505 = vmatprep.subr.mxu0 %v1747_v7  ;;  %v1225_v15 = vld [vmem:[#allocation7 + $0x348] sm:$0xff] }
 0x185   : > { %949 = vperm.xlu1 %1589, %v1457_v16   ;;  %v1035_v16 = vld [vmem:[#allocation7 + $0x240] sm:$0xff] }
 0x21e   : > { %v638_v23 = vpop.f32.mrf.mxu1 }
 0x21f   : > { %v639_v24 = vadd.f32 %v638_v23, %v566_v22  ;;  %v1222_v22 = vld [vmem:[#allocation7 + $0x330] sm:$0xff]  ;;  %v1031_v23 = vld [vmem:[#allocation7 + $0x220] sm:$0xff] }
 0x220   : > { %v826_v25 = vpop.f32.mrf.mxu0  ;;  %v1490_v30 = vpop.f32.mrf.mxu1 }
 0x221   : > { %v642_v31 = vmax.f32 %v639_v24, 0.0  ;;  %v827_v32 = vadd.f32 %v826_v25, %v755_v19  ;;  %v1033_v19 = vld [vmem:[#allocation7 + $0x230] sm:$0xff]  ;;  %v1221_v24 = vld [vmem:[#allocation7 + $0x328] sm:$0xff]  ;;  %v1030_v25 = vld [vmem:[#allocation7 + $0x218] sm:$0xff] }
 0x222   : > { %v1497_v33 = vpop.f32.mrf.mxu0  ;;  %v1029_v30 = vld [vmem:[#allocation7 + $0x210] sm:$0xff] }
 0x223   : > { %v830_v34 = vmax.f32 %v827_v32, 0.0  ;;  %740 = vmatmul.mubr.f32.vlgmr.msra.gmra.mxu1 %v642_v31  ;;  %v1219_v31 = vld [vmem:[#allocation7 + $0x318] sm:$0xff]  ;;  %v1028_v32 = vld [vmem:[#allocation7 + $0x208] sm:$0xff]  ;;  %v1218_v33 = vld [vmem:[#allocation7 + $0x310] sm:$0xff] }
 0x224   : > { %1499 = vmatpush3.msra.mxu1 %v556_v20  ;;  %1502 = vmatprep.mubr.msk.f32.mxu1 %vm1748_vm0, %v1747_v7  ;;  %v1223_v20 = vld [vmem:[#allocation7 + $0x338] sm:$0xff] }
 0x225   : > { %1500 = vmatprep.subr.mxu1 %v1747_v7  ;;  %929 = vmatmul.mubr.f32.vlgmr.msra.gmra.mxu0 %v830_v34  ;;  %v1027_v34 = vld [vmem:[#allocation7 + $0x200] sm:$0xff] }
 0x226   : > { %1501 = vmatpush3.msra.mxu1 %v550_v17  ;;  %1506 = vmatpush3.msra.mxu0 %v558_v21  ;;  %v1034_v17 = vld [vmem:[#allocation7 + $0x238] sm:$0xff]  ;;  %v1032_v21 = vld [vmem:[#allocation7 + $0x228] sm:$0xff] }
 0x227   : > { %1507 = vmatprep.subr.mxu0 %v1747_v7  ;;  %1509 = vmatprep.mubr.msk.f32.mxu0 %vm1748_vm0, %v1747_v7 }
 0x228   : > { %1508 = vmatpush3.msra.mxu0 %v552_v18  ;;  %1503 = vmatmul.mubr.msk.f32.vlgmr.msra.gmra.mxu1 %vm568_vm1, %v1456_v35  ;;  %v1224_v18 = vld [vmem:[#allocation7 + $0x340] sm:$0xff]  ;;  %v1217_v35 = vld [vmem:[#allocation7 + $0x308] sm:$0xff] }
 0x229   : > { %1510 = vmatmul.mubr.msk.f32.vlgmr.msra.gmra.mxu0 %vm568_vm1, %v1459_v36  ;;  %1059 = vmatprep.subr.mxu1 %v1058_v37  ;;  %v1216_v36 = vld [vmem:[#allocation7 + $0x300] sm:$0xff]  ;;  %v1139_v37 = vpop.permute.xlu1 %1138 }
 0x22a   : > { %1248 = vmatprep.subr.mxu0 %v1247_v38  ;;  %1060 = vmatpush1.msra.mxu1 %v1057_v39 }
 0x22b   : > { %1249 = vmatpush1.msra.mxu0 %v1246_v40  ;;  %1061 = vmatprep.subr.mxu1 %v1056_v41 }
 0x22c   : > { %1250 = vmatprep.subr.mxu0 %v1245_v42  ;;  %1062 = vmatpush1.msra.mxu1 %v1055_v43 }
 0x22d   : > { %1251 = vmatpush1.msra.mxu0 %v1244_v44  ;;  %1063 = vmatprep.subr.mxu1 %v1054_v45  ;;  %v950_v42 = vpop.permute.xlu1 %949 }
 0x22e   : > { %1252 = vmatprep.subr.mxu0 %v1243_v46  ;;  %1064 = vmatpush1.msra.mxu1 %v1053_v47 }
 0x22f   : > { %1253 = vmatpush1.msra.mxu0 %v1242_v48  ;;  %1065 = vmatprep.subr.mxu1 %v1052_v49 }
 0x230   : > { %1254 = vmatprep.subr.mxu0 %v1241_v50  ;;  %1066 = vmatpush1.msra.mxu1 %v1051_v51 }
 0x231   : > { %1255 = vmatpush1.msra.mxu0 %v1240_v52  ;;  %1067 = vmatprep.subr.mxu1 %v1050_v53 }
 0x232   : > { %1256 = vmatprep.subr.mxu0 %v1239_v54  ;;  %1068 = vmatpush1.msra.mxu1 %v1049_v55 }
 0x233   : > { %1257 = vmatpush1.msra.mxu0 %v1238_v56  ;;  %1069 = vmatprep.subr.mxu1 %v1048_v57 }
 0x234   : > { %1258 = vmatprep.subr.mxu0 %v1237_v58  ;;  %1070 = vmatpush1.msra.mxu1 %v1047_v59 }
 0x235   : > { %1259 = vmatpush1.msra.mxu0 %v1236_v60  ;;  %1071 = vmatprep.subr.mxu1 %v1046_v61 }
 0x236   : > { %1260 = vmatprep.subr.mxu0 %v1235_v62  ;;  %1072 = vmatpush1.msra.mxu1 %v1045_v63 }
 0x237   : > { %1261 = vmatpush1.msra.mxu0 %v1234_v26  ;;  %1073 = vmatprep.subr.mxu1 %v1044_v0 }
 0x238   : > { %1262 = vmatprep.subr.mxu0 %v1233_v1  ;;  %1074 = vmatpush1.msra.mxu1 %v1043_v2 }
 0x239   : > { %1263 = vmatpush1.msra.mxu0 %v1232_v3  ;;  %1075 = vmatprep.subr.mxu1 %v1042_v4 }
 0x23a   : > { %1264 = vmatprep.subr.mxu0 %v1231_v5  ;;  %1076 = vmatpush1.msra.mxu1 %v1041_v6 }
 0x23b   : > { %1265 = vmatpush1.msra.mxu0 %v1230_v27  ;;  %1077 = vmatprep.subr.mxu1 %v1040_v8 }
 0x23c   : > { %1266 = vmatprep.subr.mxu0 %v1229_v28  ;;  %1078 = vmatpush1.msra.mxu1 %v1039_v29 }
 0x23d   : > { %1267 = vmatpush1.msra.mxu0 %v1228_v9  ;;  %1079 = vmatprep.subr.mxu1 %v1038_v10 }
 0x23e   : > { %1268 = vmatprep.subr.mxu0 %v1227_v11  ;;  %1080 = vmatpush1.msra.mxu1 %v1037_v12 }
 0x23f   : > { %1269 = vmatpush1.msra.mxu0 %v1226_v13  ;;  %1081 = vmatprep.subr.mxu1 %v1036_v14 }
 0x240   : > { %1270 = vmatprep.subr.mxu0 %v1225_v15  ;;  %1123 = vmatprep.mubr.f32.mxu1 %v1747_v7 }
 0x241   : > { %1312 = vmatprep.mubr.f32.mxu0 %v1747_v7  ;;  %1082 = vmatpush1.msra.mxu1 %v1035_v16  ;;  %v1220_v7 = vld [vmem:[#allocation7 + $0x320] sm:$0xff] }
 0x242   : > { %1083 = vmatprep.subr.mxu1 %v1034_v17  ;;  %1271 = vmatpush1.msra.mxu0 %v1224_v18 }
 0x243   : > { %1084 = vmatpush1.msra.mxu1 %v1033_v19  ;;  %1272 = vmatprep.subr.mxu0 %v1223_v20 }
 0x244   : > { %1085 = vmatprep.subr.mxu1 %v1032_v21  ;;  %1273 = vmatpush1.msra.mxu0 %v1222_v22 }
 0x245   : > { %1086 = vmatpush1.msra.mxu1 %v1031_v23  ;;  %1274 = vmatprep.subr.mxu0 %v1221_v24 }
 0x246   : > { %1087 = vmatprep.subr.mxu1 %v1030_v25  ;;  %1275 = vmatpush1.msra.mxu0 %v1220_v7 }
 0x247   : > { %1088 = vmatpush1.msra.mxu1 %v1029_v30  ;;  %1276 = vmatprep.subr.mxu0 %v1219_v31 }
 0x248   : > { %1089 = vmatprep.subr.mxu1 %v1028_v32  ;;  %1277 = vmatpush1.msra.mxu0 %v1218_v33 }
 0x249   : > { %1090 = vmatpush1.msra.mxu1 %v1027_v34  ;;  %1278 = vmatprep.subr.mxu0 %v1217_v35 }
 0x24a   : > { %1279 = vmatpush1.msra.mxu0 %v1216_v36 }
 0x2e3   : > { %v741_v38 = vpop.f32.mrf.mxu1 }
 0x2e4   : > { %746 = vst [vmem:[%s1938_s26 + $0x20] sm:$0xf] %v741_v38 }
 0x2e5   : > { %v930_v39 = vpop.f32.mrf.mxu0  ;;  %v743_v40 = vpop.f32.mrf.mxu1 }
 0x2e6   : > { %v937_v41 = vrot.slane %v930_v39, 4  ;;  %747 = vst [vmem:[%s1938_s26 + $0x28] sm:$0xf] %v743_v40 }
 0x2e7   : > { %v932_v43 = vpop.f32.mrf.mxu0 }
 0x2e8   : > { %941 = vst [vmem:[%s1938_s26 + $0x20] sm:$0xf0] %v937_v41  ;;  %v938_v44 = vrot.slane %v932_v43, 4  ;;  %v1021_v45 = vpop.f32.mrf.mxu1 }
 0x2e9   : > { %v1022_v46 = vadd.f32 %v1021_v45, %v950_v42  ;;  %v1210_v47 = vpop.f32.mrf.mxu0 }
 0x2ea   : > { %942 = vst [vmem:[%s1938_s26 + $0x28] sm:$0xf0] %v938_v44  ;;  %v1211_v48 = vadd.f32 %v1210_v47, %v1139_v37  ;;  %v1504_v49 = vpop.f32.mrf.mxu1 }
 0x2eb   : > { %v1025_v50 = vmax.f32 %v1022_v46, 0.0  ;;  %v1511_v51 = vpop.f32.mrf.mxu0 }
 0x2ec   : > { %v1214_v52 = vmax.f32 %v1211_v48, 0.0 }
 0x2ed   : > { %1124 = vmatmul.mubr.f32.vlgmr.msra.gmra.mxu1 %v1025_v50 }
 0x2ee   : > { %1313 = vmatmul.mubr.f32.vlgmr.msra.gmra.mxu0 %v1214_v52 }
 0x3ad   : > { %v1125_v53 = vpop.f32.mrf.mxu1 }
 0x3ae   : > { %1130 = vst [vmem:[%s1938_s26 + $0x30] sm:$0xf] %v1125_v53  ;;  %v1314_v54 = vpop.f32.mrf.mxu0 }
 0x3af   : > { %v1321_v55 = vrot.slane %v1314_v54, 4  ;;  %v1127_v56 = vpop.f32.mrf.mxu1 }
 0x3b0   : > { %1131 = vst [vmem:[%s1938_s26 + $0x38] sm:$0xf] %v1127_v56  ;;  %v1316_v57 = vpop.f32.mrf.mxu0 }
 0x3b1   : > { %1325 = vst [vmem:[%s1938_s26 + $0x30] sm:$0xf0] %v1321_v55  ;;  %v1322_v58 = vrot.slane %v1316_v57, 4 }
 0x3b3   : > { %1326 = vst [vmem:[%s1938_s26 + $0x38] sm:$0xf0] %v1322_v58 }
 0x3b4   : > { %1683 = shalt.err (!%p1680_p9)
}
 0x3b5   : > { %s1684_s26 = scalar_lea.hbm %s2020_s30, 1024  ;;  %s1688_s24 = scalar_lea.hbm %s2072_s5, 2048 }
 0x3b6   : > { %p1685_p13 = scmp.ne.s32.totalorder %s2020_s30, %s1684_s26  ;;  %p1689_p4 = scmp.lt.s32.totalorder %s2020_s30, %s2072_s5 }
 0x3b7   : > { %p1690_p8 = scmp.lt.s32.totalorder %s1688_s24, %s1684_s26 }
 0x3b8   : > { %p1686_p5 = pnand %p1685_p13, %p2090_p10 }
 0x3b9   : > { %p1691_p7 = por %p1690_p8, %p1689_p4 }
 0x3ba   : > { %p1687_p0 = pneg %p1686_p5 }
 0x3bc   : > { %p1692_p11 = pnand %p1691_p7, %p1687_p0 }
 0x3be   : > { %1695 = shalt.err (!%p1692_p11)
}
 0x3bf   : > { %s1751_s12 = smov 256   ;;  %s1752_s16 = smov 16  }
 0x3c0   : > { %1522 = dma.vmem_to_hbm [thread:$0]  (%p2090_p10), %s2022_s15, 1024, %s2020_s30, %s1332_s22, %s1751_s12, %s1751_s12, %s1752_s16  }
 0x3c1 PF: > { %s1361_s9 = sand.u32 1, %s1726_s18   ;;  %p2091_p1 = scmp.ne.s32.totalorder %s2079_s25, 0 }
 0x3c2   : > { %p2092_p2 = scmp.ge.s32.totalorder %s1738_s21, 2  ;;  %s1362_s11 = scalar_lea.sflag [#allocation4], %s1361_s9 }
 0x3c4   : > { %p1536_p6 = pnand %p2092_p2, %p2091_p1 }
 0x3c6   : > { %p1537_p12 = pneg %p1536_p6 }
 0x3c8   : > { %1721 = dma.done.wait (%p1537_p12), %s1362_s11, 1024  }
 0x3c9   : > { %1723 = vsyncadd (%p1537_p12), %s1362_s11, 4294966272  ;;  %p19_p3 = scmp.ge.s32.totalorder %s1858_s17, 4   ;;  %s2093_s18 = smov %s1730_s19 }
 0x3ca   : > { %s2094_s19 = smov %s1734_s20  ;;  %s2095_s20 = smov %s1867_s28 }
 0x3cb   : > { %s2096_s21 = smov %s1858_s17  ;;  %21 = sbr.rel (!%p19_p3) target bundleno = 6 (0x6), region = 102 }
 0x3d0   :  { %1367 = vsyncpa [#allocation3], 1 }
 0x3d1   :  { %1369 = vsyncpa [#allocation3 + $0x1], 1 }
 0x3d2   :  { %1370 = vsyncpa [#allocation6], 1 }
 0x3d3   :  { %1371 = vsyncpa [#allocation4], 1 }
 0x3d4   :  { %1373 = vsyncpa [#allocation4 + $0x1], 1 }

</bundles_post_ra>
